<compile_context>
chip_gen: v5e
topology: v5e:2x2
jax: 0.10.0
libtpu: 0.0.40
codegen_flags: <defaults>
</compile_context>

<pallas_src>
import functools
import numpy as np

import jax
import jax.numpy as jnp
from jax.experimental import pallas as pl
from jax.experimental.pallas import tpu as pltpu


def _round_up(x, m):
    return (x + m - 1) // m * m


# ----------------------------- Pallas matmul kernel -------------------------

def _mm_kernel(a_ref, b_ref, bias_ref, o_ref, acc_ref, *, relu):
    """Tiled matmul with fused bias + optional ReLU. Grid = (M/tm, N/tn, K/tk)."""
    @pl.when(pl.program_id(2) == 0)
    def _():
        acc_ref[...] = jnp.zeros_like(acc_ref)

    acc_ref[...] += jnp.dot(a_ref[...], b_ref[...],
                            preferred_element_type=jnp.float32)

    @pl.when(pl.program_id(2) == pl.num_programs(2) - 1)
    def _():
        r = acc_ref[...] + bias_ref[...]
        if relu:
            r = jnp.maximum(r, 0.0)
        o_ref[...] = r.astype(o_ref.dtype)


def matmul_bias_act(a_parts, b, bias, relu, out_dtype=jnp.bfloat16,
                    tm=256, tn=256):
    """C = act(concat(a_parts, axis=1) @ B + bias).

    a_parts : array [M, K] or list of arrays [M, K_i] (sum K_i = K); cast to bf16.
    b       : [K, N] weight matrix (cast to bf16).  bias: [N] or None (f32).
    M and N may be ragged w.r.t. the tile sizes (Pallas masks boundary blocks);
    K is zero-extended explicitly only when it needs chunking (>2048)."""
    if not isinstance(a_parts, (list, tuple)):
        a_parts = [a_parts]
    M = a_parts[0].shape[0]
    K = sum(int(p.shape[1]) for p in a_parts)
    N = b.shape[1]

    parts = [p.astype(jnp.bfloat16) for p in a_parts]
    b = b.astype(jnp.bfloat16)

    # K tiling: single full-K step when it fits comfortably in VMEM, else 512-chunks.
    if _round_up(K, 128) <= 2048:
        tk, Kp = K, K
    else:
        tk = 512
        Kp = _round_up(K, tk)
        parts.append(jnp.zeros((M, Kp - K), jnp.bfloat16))
        b = jnp.pad(b, ((0, Kp - K), (0, 0)))
    a = parts[0] if len(parts) == 1 else jnp.concatenate(parts, axis=1)

    tm_e = min(tm, _round_up(M, 8))
    tn_e = min(tn, _round_up(N, 128))
    # v7x has 2 TensorCores: expose >=2 parallel grid tiles for tiny matmuls.
    if pl.cdiv(M, tm_e) == 1 and pl.cdiv(N, tn_e) == 1 and N > 128:
        tn_e = 128

    if bias is None:
        bias_arr = jnp.zeros((1, N), jnp.float32)
    else:
        bias_arr = bias.reshape(1, N).astype(jnp.float32)

    grid = (pl.cdiv(M, tm_e), pl.cdiv(N, tn_e), Kp // tk)
    out = pl.pallas_call(
        functools.partial(_mm_kernel, relu=relu),
        out_shape=jax.ShapeDtypeStruct((M, N), out_dtype),
        grid_spec=pltpu.PrefetchScalarGridSpec(
            num_scalar_prefetch=0,
            grid=grid,
            in_specs=[pl.BlockSpec((tm_e, tk), lambda i, j, k: (i, k)),
                      pl.BlockSpec((tk, tn_e), lambda i, j, k: (k, j)),
                      pl.BlockSpec((1, tn_e), lambda i, j, k: (0, j))],
            out_specs=pl.BlockSpec((tm_e, tn_e), lambda i, j, k: (i, j)),
            scratch_shapes=[pltpu.VMEM((tm_e, tn_e), jnp.float32)]),
        compiler_params=pltpu.CompilerParams(
            dimension_semantics=("parallel", "parallel", "arbitrary"),
            vmem_limit_bytes=32 * 1024 * 1024),
    )(a, b, bias_arr)
    return out


# ------------------------------ Pallas pool kernel ---------------------------

def _pool_kernel(x_ref, o_ref, *, kh, kw, op, oh, ow):
    """x_ref: (1, Hp, Wp, C) padded activation; o_ref: (1, oh, ow, C) with
    oh = Hp-kh+1, ow = Wp-kw+1.  Computes the stride-1 max/avg pooled map by
    reducing the kh*kw window offsets directly from VMEM (no stacked windows)."""
    if oh == 1 and ow == 1:
        # window covers the full spatial extent (global pool)
        x = x_ref[0].astype(jnp.float32)
        if op == 'max':
            r = jnp.max(x, axis=(0, 1), keepdims=True)
        else:
            r = jnp.mean(x, axis=(0, 1), keepdims=True)
        o_ref[0] = r.astype(o_ref.dtype)
        return

    acc = None
    for dy in range(kh):
        for dx in range(kw):
            v = x_ref[0, pl.ds(dy, oh), pl.ds(dx, ow), :]
            if op == 'avg':
                v = v.astype(jnp.float32)
            if acc is None:
                acc = v
            elif op == 'max':
                acc = jnp.maximum(acc, v)
            else:
                acc = acc + v
    if op == 'avg':
        acc = acc * (1.0 / (kh * kw))
    o_ref[0] = acc.astype(o_ref.dtype)


@functools.partial(jax.jit, static_argnames=('kh', 'kw', 'sh', 'sw', 'ph', 'pw', 'op'))
def pool2d(x, *, kh, kw, sh, sw, ph, pw, op):
    """max/avg pool.  'avg' uses count_include_pad=True (zero-padded window counts
    the pad positions), matching PyTorch's F.avg_pool2d default used by Inception.
    NOTE: 'max' pads with zeros; safe here because every max pool in this net has
    ph=pw=0 (post-ReLU inputs anyway)."""
    B, H, W, C = x.shape
    if ph or pw:
        x = jnp.pad(x, ((0, 0), (ph, ph), (pw, pw), (0, 0)))
    Hp, Wp = H + 2 * ph, W + 2 * pw
    oh, ow = Hp - kh + 1, Wp - kw + 1
    y = pl.pallas_call(
        functools.partial(_pool_kernel, kh=kh, kw=kw, op=op, oh=oh, ow=ow),
        out_shape=jax.ShapeDtypeStruct((B, oh, ow, C), x.dtype),
        grid_spec=pltpu.PrefetchScalarGridSpec(
            num_scalar_prefetch=0,
            grid=(B,),
            in_specs=[pl.BlockSpec((1, Hp, Wp, C), lambda b: (b, 0, 0, 0))],
            out_specs=pl.BlockSpec((1, oh, ow, C), lambda b: (b, 0, 0, 0))),
        compiler_params=pltpu.CompilerParams(
            dimension_semantics=("parallel",),
            vmem_limit_bytes=48 * 1024 * 1024),
    )(x)
    if sh > 1 or sw > 1:
        OH = (Hp - kh) // sh + 1
        OW = (Wp - kw) // sw + 1
        y = y[:, ::sh, ::sw, :][:, :OH, :OW, :]
    return y


# ------------------------------ conv glue ------------------------------------

def _extract_patches(x, kh, kw, sh, sw, ph, pw):
    """x: NHWC.  Returns list of [B, OH, OW, C] strided slices ordered (dy, dx)."""
    B, H, W, C = x.shape
    if ph or pw:
        x = jnp.pad(x, ((0, 0), (ph, ph), (pw, pw), (0, 0)))
    OH = (H + 2 * ph - kh) // sh + 1
    OW = (W + 2 * pw - kw) // sw + 1
    pats = []
    for dy in range(kh):
        for dx in range(kw):
            pats.append(jax.lax.slice(
                x, (0, dy, dx, 0),
                (B, dy + (OH - 1) * sh + 1, dx + (OW - 1) * sw + 1, C),
                (1, sh, sw, 1)))
    return pats, OH, OW


@functools.partial(jax.jit, static_argnames=('sh', 'sw', 'ph', 'pw', 'relu'))
def conv2d(x, w, b, *, sh, sw, ph, pw, relu):
    """x: NHWC (bf16), w: PyTorch layout [Cout, Cin, kh, kw], b: [Cout] or None."""
    B, H, W, C = x.shape
    Cout, Cin, kh, kw = w.shape
    pats, OH, OW = _extract_patches(x, kh, kw, sh, sw, ph, pw)
    parts = [p.reshape(B * OH * OW, C) for p in pats]
    wmat = jnp.transpose(w, (2, 3, 1, 0)).reshape(kh * kw * Cin, Cout)
    y = matmul_bias_act(parts, wmat, b, relu=relu, out_dtype=jnp.bfloat16)
    return y.reshape(B, OH, OW, Cout)


@jax.jit
def conv1x1_fused(x, ws, bs):
    """Fused sibling 1x1 BasicConv2d heads sharing the same NHWC input x.
    ws: list of [Cout_i, Cin, 1, 1]; bs: list of [Cout_i].  One matmul, then split."""
    B, H, W, C = x.shape
    wmat = jnp.concatenate(
        [jnp.transpose(w.reshape(w.shape[0], C)) for w in ws], axis=1)
    bias = jnp.concatenate(list(bs))
    y = matmul_bias_act(x.reshape(B * H * W, C), wmat, bias,
                        relu=True, out_dtype=jnp.bfloat16)
    outs, off = [], 0
    for w in ws:
        n = w.shape[0]
        outs.append(y[:, off:off + n].reshape(B, H, W, n))
        off += n
    return outs


def basic_conv(p, x, stride=(1, 1), padding=(0, 0)):
    # BasicConv2d = Conv2d(bias=False) + BatchNorm(eps=1e-3, folded) + ReLU
    return conv2d(x, p['w'], p['b'], sh=stride[0], sw=stride[1],
                  ph=padding[0], pw=padding[1], relu=True)


def _fused_heads(x, plist):
    return conv1x1_fused(x, [p['w'] for p in plist], [p['b'] for p in plist])


# ------------------------------ parameter init ------------------------------

def _init_basic_conv(key, cin, cout, kh, kw):
    std = float(np.sqrt(2.0 / (cin * kh * kw)))
    w = jax.random.normal(key, (cout, cin, kh, kw), jnp.float32) * std
    # BN folded: gamma=1, beta=0, running_mean=0, running_var=1, eps=1e-3
    scale = float(1.0 / np.sqrt(1.0 + 1e-3))
    return {'w': w * scale, 'b': jnp.zeros((cout,), jnp.float32)}


def _init_inception_a(key, cin, pool_features):
    k = jax.random.split(key, 7)
    return {'branch1x1': _init_basic_conv(k[0], cin, 64, 1, 1),
            'branch5x5_1': _init_basic_conv(k[1], cin, 48, 1, 1),
            'branch5x5_2': _init_basic_conv(k[2], 48, 64, 5, 5),
            'branch3x3dbl_1': _init_basic_conv(k[3], cin, 64, 1, 1),
            'branch3x3dbl_2': _init_basic_conv(k[4], 64, 96, 3, 3),
            'branch3x3dbl_3': _init_basic_conv(k[5], 96, 96, 3, 3),
            'branch_pool': _init_basic_conv(k[6], cin, pool_features, 1, 1)}


def _init_inception_b(key, cin):
    k = jax.random.split(key, 4)
    return {'branch3x3': _init_basic_conv(k[0], cin, 384, 3, 3),
            'branch3x3dbl_1': _init_basic_conv(k[1], cin, 64, 1, 1),
            'branch3x3dbl_2': _init_basic_conv(k[2], 64, 96, 3, 3),
            'branch3x3dbl_3': _init_basic_conv(k[3], 96, 96, 3, 3)}


def _init_inception_c(key, cin, c7):
    k = jax.random.split(key, 10)
    return {'branch1x1': _init_basic_conv(k[0], cin, 192, 1, 1),
            'branch7x7_1': _init_basic_conv(k[1], cin, c7, 1, 1),
            'branch7x7_2': _init_basic_conv(k[2], c7, c7, 1, 7),
            'branch7x7_3': _init_basic_conv(k[3], c7, 192, 7, 1),
            'branch7x7dbl_1': _init_basic_conv(k[4], cin, c7, 1, 1),
            'branch7x7dbl_2': _init_basic_conv(k[5], c7, c7, 7, 1),
            'branch7x7dbl_3': _init_basic_conv(k[6], c7, c7, 1, 7),
            'branch7x7dbl_4': _init_basic_conv(k[7], c7, c7, 7, 1),
            'branch7x7dbl_5': _init_basic_conv(k[8], c7, 192, 1, 7),
            'branch_pool': _init_basic_conv(k[9], cin, 192, 1, 1)}


def _init_inception_d(key, cin):
    k = jax.random.split(key, 6)
    return {'branch3x3_1': _init_basic_conv(k[0], cin, 192, 1, 1),
            'branch3x3_2': _init_basic_conv(k[1], 192, 320, 3, 3),
            'branch7x7x3_1': _init_basic_conv(k[2], cin, 192, 1, 1),
            'branch7x7x3_2': _init_basic_conv(k[3], 192, 192, 1, 7),
            'branch7x7x3_3': _init_basic_conv(k[4], 192, 192, 7, 1),
            'branch7x7x3_4': _init_basic_conv(k[5], 192, 192, 3, 3)}


def _init_inception_e(key, cin):
    k = jax.random.split(key, 9)
    return {'branch1x1': _init_basic_conv(k[0], cin, 320, 1, 1),
            'branch3x3_1': _init_basic_conv(k[1], cin, 384, 1, 1),
            'branch3x3_2a': _init_basic_conv(k[2], 384, 384, 1, 3),
            'branch3x3_2b': _init_basic_conv(k[3], 384, 384, 3, 1),
            'branch3x3dbl_1': _init_basic_conv(k[4], cin, 448, 1, 1),
            'branch3x3dbl_2': _init_basic_conv(k[5], 448, 384, 3, 3),
            'branch3x3dbl_3a': _init_basic_conv(k[6], 384, 384, 1, 3),
            'branch3x3dbl_3b': _init_basic_conv(k[7], 384, 384, 3, 1),
            'branch_pool': _init_basic_conv(k[8], cin, 192, 1, 1)}


def init_params(key, nef=256):
    ks = iter(jax.random.split(key, 64))
    nk = lambda: next(ks)
    P = {}
    P['Conv2d_1a_3x3'] = _init_basic_conv(nk(), 3, 32, 3, 3)
    P['Conv2d_2a_3x3'] = _init_basic_conv(nk(), 32, 32, 3, 3)
    P['Conv2d_2b_3x3'] = _init_basic_conv(nk(), 32, 64, 3, 3)
    P['Conv2d_3b_1x1'] = _init_basic_conv(nk(), 64, 80, 1, 1)
    P['Conv2d_4a_3x3'] = _init_basic_conv(nk(), 80, 192, 3, 3)
    P['Mixed_5b'] = _init_inception_a(nk(), 192, 32)
    P['Mixed_5c'] = _init_inception_a(nk(), 256, 64)
    P['Mixed_5d'] = _init_inception_a(nk(), 288, 64)
    P['Mixed_6a'] = _init_inception_b(nk(), 288)
    P['Mixed_6b'] = _init_inception_c(nk(), 768, 128)
    P['Mixed_6c'] = _init_inception_c(nk(), 768, 160)
    P['Mixed_6d'] = _init_inception_c(nk(), 768, 160)
    P['Mixed_6e'] = _init_inception_c(nk(), 768, 192)
    P['Mixed_7a'] = _init_inception_d(nk(), 768)
    P['Mixed_7b'] = _init_inception_e(nk(), 1280)
    P['Mixed_7c'] = _init_inception_e(nk(), 2048)
    # trainable heads: init_trainable_weights() -> uniform(-0.1, 0.1) weights
    P['emb_features_w'] = jax.random.uniform(nk(), (nef, 768, 1, 1),
                                             jnp.float32, -0.1, 0.1)
    kw_, kb_ = jax.random.split(nk())
    P['emb_cnn_code_w'] = jax.random.uniform(kw_, (nef, 2048), jnp.float32, -0.1, 0.1)
    bound = float(1.0 / np.sqrt(2048.0))
    P['emb_cnn_code_b'] = jax.random.uniform(kb_, (nef,), jnp.float32, -bound, bound)
    return P


# ------------------------------ Inception blocks ----------------------------

def _inception_a(p, x):
    b1, b5, bd = _fused_heads(
        x, [p['branch1x1'], p['branch5x5_1'], p['branch3x3dbl_1']])
    b5 = basic_conv(p['branch5x5_2'], b5, padding=(2, 2))
    bd = basic_conv(p['branch3x3dbl_2'], bd, padding=(1, 1))
    bd = basic_conv(p['branch3x3dbl_3'], bd, padding=(1, 1))
    bp = pool2d(x, kh=3, kw=3, sh=1, sw=1, ph=1, pw=1, op='avg')
    bp = basic_conv(p['branch_pool'], bp)
    return jnp.concatenate([b1, b5, bd, bp], axis=-1)


def _inception_b(p, x):
    b3 = basic_conv(p['branch3x3'], x, stride=(2, 2))
    bd = basic_conv(p['branch3x3dbl_1'], x)
    bd = basic_conv(p['branch3x3dbl_2'], bd, padding=(1, 1))
    bd = basic_conv(p['branch3x3dbl_3'], bd, stride=(2, 2))
    bp = pool2d(x, kh=3, kw=3, sh=2, sw=2, ph=0, pw=0, op='max')
    return jnp.concatenate([b3, bd, bp], axis=-1)


def _inception_c(p, x):
    b1, b7, bd = _fused_heads(
        x, [p['branch1x1'], p['branch7x7_1'], p['branch7x7dbl_1']])
    b7 = basic_conv(p['branch7x7_2'], b7, padding=(0, 3))
    b7 = basic_conv(p['branch7x7_3'], b7, padding=(3, 0))
    bd = basic_conv(p['branch7x7dbl_2'], bd, padding=(3, 0))
    bd = basic_conv(p['branch7x7dbl_3'], bd, padding=(0, 3))
    bd = basic_conv(p['branch7x7dbl_4'], bd, padding=(3, 0))
    bd = basic_conv(p['branch7x7dbl_5'], bd, padding=(0, 3))
    bp = pool2d(x, kh=3, kw=3, sh=1, sw=1, ph=1, pw=1, op='avg')
    bp = basic_conv(p['branch_pool'], bp)
    return jnp.concatenate([b1, b7, bd, bp], axis=-1)


def _inception_d(p, x):
    b3, b7 = _fused_heads(x, [p['branch3x3_1'], p['branch7x7x3_1']])
    b3 = basic_conv(p['branch3x3_2'], b3, stride=(2, 2))
    b7 = basic_conv(p['branch7x7x3_2'], b7, padding=(0, 3))
    b7 = basic_conv(p['branch7x7x3_3'], b7, padding=(3, 0))
    b7 = basic_conv(p['branch7x7x3_4'], b7, stride=(2, 2))
    bp = pool2d(x, kh=3, kw=3, sh=2, sw=2, ph=0, pw=0, op='max')
    return jnp.concatenate([b3, b7, bp], axis=-1)


def _inception_e(p, x):
    b1, b3, bd = _fused_heads(
        x, [p['branch1x1'], p['branch3x3_1'], p['branch3x3dbl_1']])
    b3 = jnp.concatenate([basic_conv(p['branch3x3_2a'], b3, padding=(0, 1)),
                          basic_conv(p['branch3x3_2b'], b3, padding=(1, 0))], axis=-1)
    bd = basic_conv(p['branch3x3dbl_2'], bd, padding=(1, 1))
    bd = jnp.concatenate([basic_conv(p['branch3x3dbl_3a'], bd, padding=(0, 1)),
                          basic_conv(p['branch3x3dbl_3b'], bd, padding=(1, 0))], axis=-1)
    bp = pool2d(x, kh=3, kw=3, sh=1, sw=1, ph=1, pw=1, op='avg')
    bp = basic_conv(p['branch_pool'], bp)
    return jnp.concatenate([b1, b3, bd, bp], axis=-1)


# --------------------------------- forward ----------------------------------

def cnn_encoder_forward(params, x_nchw, nef=256):
    B, C_in, _, _ = x_nchw.shape
    # NCHW -> NHWC on the tiny input, then nn.Upsample(size=(299,299), 'bilinear').
    x = jnp.transpose(x_nchw.astype(jnp.float32), (0, 2, 3, 1))
    x = jax.image.resize(x, (B, 299, 299, C_in), method='bilinear')
    x = x.astype(jnp.bfloat16)
    x = basic_conv(params['Conv2d_1a_3x3'], x, stride=(2, 2))    # 149x149x32
    x = basic_conv(params['Conv2d_2a_3x3'], x)                   # 147x147x32
    x = basic_conv(params['Conv2d_2b_3x3'], x, padding=(1, 1))   # 147x147x64
    x = pool2d(x, kh=3, kw=3, sh=2, sw=2, ph=0, pw=0, op='max')  # 73x73x64
    x = basic_conv(params['Conv2d_3b_1x1'], x)                   # 73x73x80
    x = basic_conv(params['Conv2d_4a_3x3'], x)                   # 71x71x192
    x = pool2d(x, kh=3, kw=3, sh=2, sw=2, ph=0, pw=0, op='max')  # 35x35x192
    x = _inception_a(params['Mixed_5b'], x)                      # 35x35x256
    x = _inception_a(params['Mixed_5c'], x)                      # 35x35x288
    x = _inception_a(params['Mixed_5d'], x)                      # 35x35x288
    x = _inception_b(params['Mixed_6a'], x)                      # 17x17x768
    x = _inception_c(params['Mixed_6b'], x)
    x = _inception_c(params['Mixed_6c'], x)
    x = _inception_c(params['Mixed_6d'], x)
    x = _inception_c(params['Mixed_6e'], x)                      # 17x17x768
    features = x
    x = _inception_d(params['Mixed_7a'], x)                      # 8x8x1280
    x = _inception_e(params['Mixed_7b'], x)                      # 8x8x2048
    x = _inception_e(params['Mixed_7c'], x)                      # 8x8x2048
    x = pool2d(x, kh=8, kw=8, sh=8, sw=8, ph=0, pw=0, op='avg')  # 1x1x2048
    x = x.reshape(B, 2048)
    # emb_cnn_code: Linear(2048, nef)
    cnn_code = matmul_bias_act(x, params['emb_cnn_code_w'].T,
                               params['emb_cnn_code_b'], relu=False,
                               out_dtype=jnp.float32)
    # emb_features: conv1x1(768, nef), bias=False
    f = features.reshape(B * 17 * 17, 768)
    wf = params['emb_features_w'].reshape(nef, 768).T
    f = matmul_bias_act(f, wf, None, relu=False, out_dtype=jnp.float32)
    features_out = jnp.transpose(f.reshape(B, 17, 17, nef), (0, 3, 1, 2))  # NCHW
    return features_out, cnn_code


if __name__ == "__main__":
    key = jax.random.PRNGKey(0)
    kp, kx = jax.random.split(key)
    nef = 256
    params = init_params(kp, nef=nef)
    x = jax.random.normal(kx, (2, 3, 16, 16), jnp.float32)   # NCHW, 3-channel image
    features, cnn_code = cnn_encoder_forward(params, x, nef=nef)
    jax.block_until_ready((features, cnn_code))
    assert features.shape == (2, nef, 17, 17), features.shape
    assert cnn_code.shape == (2, nef), cnn_code.shape
    print("KERNEL_OK")
</pallas_src>

<mosaic_0001>
module attributes {stable_mosaic.version = 11 : i64} {
  func.func @_mm_kernel(%arg0: i32, %arg1: i32, %arg2: i32, %arg3: memref<256x27xbf16, #tpu.memory_space<vmem>>, %arg4: memref<27x128xbf16, #tpu.memory_space<vmem>>, %arg5: memref<1x128xf32, #tpu.memory_space<vmem>>, %arg6: memref<256x128xbf16, #tpu.memory_space<vmem>>, %arg7: memref<256x128xf32, #tpu.memory_space<vmem>>) attributes {dimension_semantics = [#tpu.dimension_semantics<parallel>, #tpu.dimension_semantics<parallel>, #tpu.dimension_semantics<arbitrary>], iteration_bounds = array<i64: 174, 1, 1>, scalar_prefetch = 0 : i64, scratch_operands = 1 : i64, tpu.core_type = #tpu.core_type<tc>, window_params = [{transform_indices = @transform_0, window_bounds = array<i64: 256, 27>}, {transform_indices = @transform_1, window_bounds = array<i64: 27, 128>}, {transform_indices = @transform_2, window_bounds = array<i64: 1, 128>}, {transform_indices = @transform_3, window_bounds = array<i64: 256, 128>}]} {
    %c0_i32 = arith.constant 0 : i32
    %0 = arith.cmpi eq, %arg2, %c0_i32 : i32
    %1 = arith.extui %0 : i1 to i32
    %c0_i32_0 = arith.constant 0 : i32
    %2 = arith.cmpi ne, %1, %c0_i32_0 : i32
    scf.if %2 {
      %cst_10 = arith.constant 0.000000e+00 : f32
      %12 = vector.broadcast %cst_10 : f32 to vector<256x128xf32>
      %c0_11 = arith.constant 0 : index
      %c0_12 = arith.constant 0 : index
      %13 = vector.load %arg7[%c0_11, %c0_12] : memref<256x128xf32, #tpu.memory_space<vmem>>, vector<256x128xf32>
      tpu.vector_store %arg7[%c0_11, %c0_12], %12 {strides = array<i32>} : memref<256x128xf32, #tpu.memory_space<vmem>>, vector<256x128xf32>,
    } else {
    }
    %c0 = arith.constant 0 : index
    %c0_1 = arith.constant 0 : index
    %3 = vector.load %arg7[%c0, %c0_1] : memref<256x128xf32, #tpu.memory_space<vmem>>, vector<256x128xf32>
    %c0_2 = arith.constant 0 : index
    %c0_3 = arith.constant 0 : index
    %4 = vector.load %arg3[%c0_2, %c0_3] : memref<256x27xbf16, #tpu.memory_space<vmem>>, vector<256x27xbf16>
    %c0_4 = arith.constant 0 : index
    %c0_5 = arith.constant 0 : index
    %5 = vector.load %arg4[%c0_4, %c0_5] : memref<27x128xbf16, #tpu.memory_space<vmem>>, vector<27x128xbf16>
    %cst = arith.constant dense<0.000000e+00> : vector<256x128xf32>
    %6 = tpu.matmul %4, %5, %cst {dimension_numbers = #tpu.dot_dimension_numbers<[1], [0], [0], [1], [0, 0, 1, 1], [], []>} : vector<256x27xbf16>, vector<27x128xbf16>, vector<256x128xf32> -> vector<256x128xf32>
    %7 = arith.addf %3, %6 : vector<256x128xf32>
    %c0_6 = arith.constant 0 : index
    %c0_7 = arith.constant 0 : index
    %8 = vector.load %arg7[%c0_6, %c0_7] : memref<256x128xf32, #tpu.memory_space<vmem>>, vector<256x128xf32>
    tpu.vector_store %arg7[%c0_6, %c0_7], %7 {strides = array<i32>} : memref<256x128xf32, #tpu.memory_space<vmem>>, vector<256x128xf32>,
    %c0_i32_8 = arith.constant 0 : i32
    %9 = arith.cmpi eq, %arg2, %c0_i32_8 : i32
    %10 = arith.extui %9 : i1 to i32
    %c0_i32_9 = arith.constant 0 : i32
    %11 = arith.cmpi ne, %10, %c0_i32_9 : i32
    scf.if %11 {
      %c0_10 = arith.constant 0 : index
      %c0_11 = arith.constant 0 : index
      %12 = vector.load %arg7[%c0_10, %c0_11] : memref<256x128xf32, #tpu.memory_space<vmem>>, vector<256x128xf32>
      %c0_12 = arith.constant 0 : index
      %c0_13 = arith.constant 0 : index
      %13 = vector.load %arg5[%c0_12, %c0_13] : memref<1x128xf32, #tpu.memory_space<vmem>>, vector<1x128xf32>
      %14 = vector.broadcast %13 : vector<1x128xf32> to vector<256x128xf32>
      %15 = arith.addf %12, %14 : vector<256x128xf32>
      %cst_14 = arith.constant 0.000000e+00 : f32
      %16 = vector.broadcast %cst_14 : f32 to vector<256x128xf32>
      %17 = arith.maximumf %15, %16 : vector<256x128xf32>
      %18 = arith.truncf %17 : vector<256x128xf32> to vector<256x128xbf16>
      %c0_15 = arith.constant 0 : index
      %c0_16 = arith.constant 0 : index
      %19 = vector.load %arg6[%c0_15, %c0_16] : memref<256x128xbf16, #tpu.memory_space<vmem>>, vector<256x128xbf16>
      tpu.vector_store %arg6[%c0_15, %c0_16], %18 {strides = array<i32>} : memref<256x128xbf16, #tpu.memory_space<vmem>>, vector<256x128xbf16>,
    } else {
    }
    return
  }
  func.func @transform_0(%arg0: i32, %arg1: i32, %arg2: i32) -> (i32, i32) {
    %c0_i32 = arith.constant 0 : i32
    return %arg0, %arg2 : i32, i32
  }
  func.func @transform_1(%arg0: i32, %arg1: i32, %arg2: i32) -> (i32, i32) {
    %c0_i32 = arith.constant 0 : i32
    return %arg2, %arg1 : i32, i32
  }
  func.func @transform_2(%arg0: i32, %arg1: i32, %arg2: i32) -> (i32, i32) {
    %c0_i32 = arith.constant 0 : i32
    %c0_i32_0 = arith.constant 0 : i32
    return %c0_i32, %arg1 : i32, i32
  }
  func.func @transform_3(%arg0: i32, %arg1: i32, %arg2: i32) -> (i32, i32) {
    %c0_i32 = arith.constant 0 : i32
    return %arg0, %arg1 : i32, i32
  }
}

</mosaic_0001>

<bundles_post_ra>
// kernel: conv2d.1
= control target key start
LH: loop header
LB: loop body
LE: loop exit
PB: predicated region body
PF: predicated region fallthrough
CT: control target
= control target key end

     0   :  { %s1698_s12 = smov 0   ;;  %s1700_s13 = smov 0   ;;  %s1995_s0 = inlined_call_operand.vmem [shape: bf16[44402,27], index: 0, kind: input, shape index: {}]   ;;  %s1996_s1 = inlined_call_operand.vmem [shape: bf16[27,32], index: 1, kind: input, shape index: {}]   ;;  %s1997_s2 = inlined_call_operand.vmem [shape: f32[1,32], index: 2, kind: input, shape index: {}]   ;;  %s1998_s3 = inlined_call_operand.vmem [shape: bf16[44402,32], index: 3, kind: output, shape index: {}]  }
   0x1   :  { %s1702_s14 = smov 0   ;;  %s1704_s15 = smov 0  }
   0x2   :  { %s1706_s16 = smov 0  }
   0x3 LB: > { %s1230_s17 = sadd.s32 4294967295, %s1643_s16   ;;  %s32_s18 = sadd.s32 1, %s1639_s15  ;;  %s1643_s16 = sphi %s1706_s16, %s13_s16   ;;  %s1639_s15 = sphi %s1704_s15, %s2008_s15   ;;  %s1635_s14 = sphi %s1702_s14, %s2007_s14   ;;  %s1631_s13 = sphi %s1700_s13, %s2006_s13   ;;  %s1627_s12 = sphi %s1698_s12, %s2005_s12  }
   0x4   : > { %p34_p0 = scmp.ge.s32.totalorder %s32_s18, 174  ;;  %s123_s19 = sadd.s32 1, %s1631_s13 }
   0x5   : > { %p133_p1 = scmp.ne.s32.totalorder %s1631_s13, %s1627_s12  ;;  %p134_p2 = scmp.eq.s32.totalorder %s1230_s17, 173 }
   0x6   : > { %s2010_s18 = smov (%p34_p0, %s32_s18), 0  ;;  %p1236_p4 = scmp.ge.s32.totalorder %s1643_s16, 1 }
   0x7   : > { %p1730_p3 = por %p134_p2, %p133_p1  ;;  %s118_s21 = ssub.s32 %s1639_s15, %s2010_s18 }
   0x8   : > { %p196_p5 = scmp.lt.s32.totalorder %s1643_s16, 175  ;;  %p121_p6 = scmp.eq.s32.totalorder %s118_s21, 0 }
   0xa   : > { %p197_p7 = pnand %p1236_p4, %p196_p5 }
   0xb   : > { %s1739_s22 = scalar_select %p121_p6, %s1631_s13, %s123_s19  }
   0xc   : > { %200 = sbr.rel (%p197_p7) target bundleno = 291 (0x123), region = 32  ;;  %s1748_s27 = sshll.u32 (!%p197_p7), %s1635_s14, 5 }
   0xd   : > { %p242_p8 = scmp.lt.s32.totalorder (!%p197_p7), %s1748_s27, 5550  ;;  %s234_s10 = sand.u32 (!%p197_p7), 1, %s1627_s12  }
   0xe   : > { %s1237_s11 = sshll.u32 (!%p197_p7), %s234_s10, 7 }
   0xf   : > { %s1804_s12 = scalar_lea.vmem (!%p197_p7), [#allocation3], %s1237_s11  }
  0x11   : > { %v1310_v0 = vld [vmem:[%s1996_s1 + $0x8] sm:$0xf]  ;;  %v1362_v1 = vld [vmem:[%s1996_s1 + $0x8] sm:$0x30]  ;;  %vm516_vm0 = vcmask 1044480   ;;  %vm517_vm1 = vcmask 1045504  }
  0x12   : > { %v1311_v2 = vor.u32 %v1362_v1, %v1310_v0  ;;  %v1677_v3 = vmov 65535   ;;  %s243_s28 = scalar_select %p242_p8, %s1748_s27, 5550  ;;  %v1361_v7 = vld [vmem:[%s1996_s1] sm:$0xff]  ;;  %vm467_vm2 = vcmask 220160  }
  0x13   : > { %v518_v4 = vsel %vm516_vm0, 4294967295, %v1677_v3  ;;  %v1795_v26 = vld [vmem:[%s1997_s2] ss:$0 sm:$0xff]  ;;  %s851_s17 = ssub.s32 (%p1730_p3), 5551, %s1748_s27  ;;  %s1363_s19 = sshll.u32 (%p1730_p3), %s1635_s14, 7 }
  0x14   : > { %v519_v5 = vsel %vm517_vm1, %v518_v4, 0  ;;  %s1239_s4 = sshll.u32 %s243_s28, 2  ;;  %p852_p9 = scmp.lt.s32.totalorder (%p1730_p3), %s851_s17, 32 }
  0x15   : > { %v521_v6 = vand.u32 %v1311_v2, %v519_v5  ;;  %s1758_s7 = scalar_lea.vmem %s1995_s0, %s1239_s4  ;;  %s1855_s24 = scalar_lea.vmem (%p1730_p3), %s1998_s3, %s1363_s19  }
  0x16   : > { %v1345_v8 = vld [vmem:[%s1758_s7] sm:$0xff]  ;;  %v1346_v12 = vld [vmem:[%s1758_s7 + $0x8] sm:$0xff]  ;;  %v1347_v16 = vld [vmem:[%s1758_s7 + $0x10] sm:$0xff] }
  0x17   : > { %529 = vmatpush.bf16.msra.mxu0 %v521_v6  ;;  %1461 = vmatpush.bf16.msra.mxu1 %v521_v6  ;;  %v1349_v9 = vld [vmem:[%s1758_s7 + $0x20] sm:$0xff]  ;;  %v1350_v13 = vld [vmem:[%s1758_s7 + $0x28] sm:$0xff]  ;;  %v1351_v17 = vld [vmem:[%s1758_s7 + $0x30] sm:$0xff] }
  0x18   : > { %1462 = vmatpush.bf16.msra.mxu2 %v521_v6  ;;  %1463 = vmatpush.bf16.msra.mxu3 %v521_v6  ;;  %v1353_v10 = vld [vmem:[%s1758_s7 + $0x40] sm:$0xff]  ;;  %v1354_v14 = vld [vmem:[%s1758_s7 + $0x48] sm:$0xff]  ;;  %v1355_v18 = vld [vmem:[%s1758_s7 + $0x50] sm:$0xff] }
  0x19   : > { %v1357_v11 = vld [vmem:[%s1758_s7 + $0x60] sm:$0xff]  ;;  %v1358_v15 = vld [vmem:[%s1758_s7 + $0x68] sm:$0xff]  ;;  %v1359_v19 = vld [vmem:[%s1758_s7 + $0x70] sm:$0xff] }
  0x1a   : > { %v1348_v20 = vld [vmem:[%s1758_s7 + $0x18] sm:$0xff] }
  0x1b   : > { %530 = vmatpush.bf16.msra.mxu0 %v1361_v7  ;;  %1464 = vmatpush.bf16.msra.mxu1 %v1361_v7  ;;  %v1352_v21 = vld [vmem:[%s1758_s7 + $0x38] sm:$0xff] }
  0x1c   : > { %1465 = vmatpush.bf16.msra.mxu2 %v1361_v7  ;;  %1466 = vmatpush.bf16.msra.mxu3 %v1361_v7  ;;  %v1356_v22 = vld [vmem:[%s1758_s7 + $0x58] sm:$0xff] }
  0x1d   : > { %v1360_v23 = vld [vmem:[%s1758_s7 + $0x78] sm:$0xff] }
  0x1e   : > { %1312 = vmatmul.msk.bf16.vlgmr.msra.gmra.mxu0 %vm467_vm2, %v1345_v8  ;;  %1316 = vmatmul.msk.bf16.vlgmr.msra.gmra.mxu1 %vm467_vm2, %v1349_v9 }
  0x1f   : > { %1320 = vmatmul.msk.bf16.vlgmr.msra.gmra.mxu2 %vm467_vm2, %v1353_v10  ;;  %1324 = vmatmul.msk.bf16.vlgmr.msra.gmra.mxu3 %vm467_vm2, %v1357_v11 }
  0x2e   : > { %1313 = vmatmul.msk.bf16.gmra.mxu0 %vm467_vm2, %v1346_v12  ;;  %1317 = vmatmul.msk.bf16.gmra.mxu1 %vm467_vm2, %v1350_v13 }
  0x2f   : > { %1321 = vmatmul.msk.bf16.gmra.mxu2 %vm467_vm2, %v1354_v14  ;;  %1325 = vmatmul.msk.bf16.gmra.mxu3 %vm467_vm2, %v1358_v15 }
  0x3e   : > { %1314 = vmatmul.msk.bf16.gmra.mxu0 %vm467_vm2, %v1347_v16  ;;  %1318 = vmatmul.msk.bf16.gmra.mxu1 %vm467_vm2, %v1351_v17 }
  0x3f   : > { %1322 = vmatmul.msk.bf16.gmra.mxu2 %vm467_vm2, %v1355_v18  ;;  %1326 = vmatmul.msk.bf16.gmra.mxu3 %vm467_vm2, %v1359_v19 }
  0x4e   : > { %1315 = vmatmul.msk.bf16.gmra.mxu0 %vm467_vm2, %v1348_v20  ;;  %1319 = vmatmul.msk.bf16.gmra.mxu1 %vm467_vm2, %v1352_v21 }
  0x4f   : > { %1323 = vmatmul.msk.bf16.gmra.mxu2 %vm467_vm2, %v1356_v22  ;;  %1327 = vmatmul.msk.bf16.gmra.mxu3 %vm467_vm2, %v1360_v23 }
  0x9b   : > { %v532_v24 = vpop.f32.mrf.mxu0  ;;  %v552_v25 = vpop.f32.mrf.mxu1 }
  0x9c   : > { %v715_v27 = vadd.f32 %v1795_v26, %v532_v24  ;;  %v723_v28 = vadd.f32 %v1795_v26, %v552_v25 }
  0x9e   : > { %v747_v35 = vmax.f32 %v715_v27, 0.0  ;;  %v755_v36 = vmax.f32 %v723_v28, 0.0 }
  0xa2   : > { %v572_v29 = vpop.f32.mrf.mxu2  ;;  %v592_v30 = vpop.f32.mrf.mxu3 }
  0xa3   : > { %v534_v31 = vpop.f32.mrf.mxu0  ;;  %v554_v32 = vpop.f32.mrf.mxu1  ;;  %v731_v41 = vadd.f32 %v1795_v26, %v572_v29  ;;  %v739_v42 = vadd.f32 %v1795_v26, %v592_v30 }
  0xa4   : > { %v716_v33 = vadd.f32 %v1795_v26, %v534_v31  ;;  %v724_v34 = vadd.f32 %v1795_v26, %v554_v32 }
  0xa5   : > { %v763_v49 = vmax.f32 %v731_v41, 0.0  ;;  %v771_v50 = vmax.f32 %v739_v42, 0.0 }
  0xa6   : > { %v748_v37 = vmax.f32 %v716_v33, 0.0  ;;  %v756_v38 = vmax.f32 %v724_v34, 0.0 }
  0xa8   : > { %v1369_v39 = vpack.c.bf16 %v748_v37, %v747_v35  ;;  %v1389_v40 = vpack.c.bf16 %v756_v38, %v755_v36 }
  0xaa   : > { %1370 = vst [vmem:[%s1804_s12] sm:$0xff] %v1369_v39   ;;  %v574_v43 = vpop.f32.mrf.mxu2  ;;  %v594_v44 = vpop.f32.mrf.mxu3 }
  0xab   : > { %1449 = vst [vmem:[%s1804_s12 + $0x20] sm:$0xff] %v1389_v40   ;;  %v732_v45 = vadd.f32 %v1795_v26, %v574_v43  ;;  %v740_v46 = vadd.f32 %v1795_v26, %v594_v44  ;;  %v537_v47 = vpop.f32.mrf.mxu0  ;;  %v557_v48 = vpop.f32.mrf.mxu1 }
  0xac   : > { %v717_v55 = vadd.f32 %v1795_v26, %v537_v47  ;;  %v725_v56 = vadd.f32 %v1795_v26, %v557_v48 }
  0xad   : > { %v764_v51 = vmax.f32 %v732_v45, 0.0  ;;  %v772_v52 = vmax.f32 %v740_v46, 0.0 }
  0xae   : > { %v749_v63 = vmax.f32 %v717_v55, 0.0  ;;  %v757_v0 = vmax.f32 %v725_v56, 0.0 }
  0xaf   : > { %v1409_v53 = vpack.c.bf16 %v764_v51, %v763_v49  ;;  %v1429_v54 = vpack.c.bf16 %v772_v52, %v771_v50 }
  0xb1   : > { %1453 = vst [vmem:[%s1804_s12 + $0x40] sm:$0xff] %v1409_v53  }
  0xb2   : > { %1457 = vst [vmem:[%s1804_s12 + $0x60] sm:$0xff] %v1429_v54   ;;  %v577_v57 = vpop.f32.mrf.mxu2  ;;  %v597_v58 = vpop.f32.mrf.mxu3 }
  0xb3   : > { %v539_v59 = vpop.f32.mrf.mxu0  ;;  %v559_v60 = vpop.f32.mrf.mxu1  ;;  %v733_v5 = vadd.f32 %v1795_v26, %v577_v57  ;;  %v741_v6 = vadd.f32 %v1795_v26, %v597_v58 }
  0xb4   : > { %v718_v61 = vadd.f32 %v1795_v26, %v539_v59  ;;  %v726_v62 = vadd.f32 %v1795_v26, %v559_v60 }
  0xb5   : > { %v765_v13 = vmax.f32 %v733_v5, 0.0  ;;  %v773_v14 = vmax.f32 %v741_v6, 0.0 }
  0xb6   : > { %v750_v1 = vmax.f32 %v718_v61, 0.0  ;;  %v758_v2 = vmax.f32 %v726_v62, 0.0 }
  0xb8   : > { %v1374_v3 = vpack.c.bf16 %v750_v1, %v749_v63  ;;  %v1394_v4 = vpack.c.bf16 %v758_v2, %v757_v0 }
  0xba   : > { %1446 = vst [vmem:[%s1804_s12 + $0x8] sm:$0xff] %v1374_v3   ;;  %v579_v7 = vpop.f32.mrf.mxu2  ;;  %v599_v8 = vpop.f32.mrf.mxu3 }
  0xbb   : > { %1450 = vst [vmem:[%s1804_s12 + $0x28] sm:$0xff] %v1394_v4   ;;  %v734_v9 = vadd.f32 %v1795_v26, %v579_v7  ;;  %v742_v10 = vadd.f32 %v1795_v26, %v599_v8  ;;  %v542_v11 = vpop.f32.mrf.mxu0  ;;  %v562_v12 = vpop.f32.mrf.mxu1 }
  0xbc   : > { %v719_v19 = vadd.f32 %v1795_v26, %v542_v11  ;;  %v727_v20 = vadd.f32 %v1795_v26, %v562_v12 }
  0xbd   : > { %v766_v15 = vmax.f32 %v734_v9, 0.0  ;;  %v774_v16 = vmax.f32 %v742_v10, 0.0 }
  0xbe   : > { %v751_v28 = vmax.f32 %v719_v19, 0.0  ;;  %v759_v29 = vmax.f32 %v727_v20, 0.0 }
  0xbf   : > { %v1414_v17 = vpack.c.bf16 %v766_v15, %v765_v13  ;;  %v1434_v18 = vpack.c.bf16 %v774_v16, %v773_v14 }
  0xc1   : > { %1454 = vst [vmem:[%s1804_s12 + $0x48] sm:$0xff] %v1414_v17  }
  0xc2   : > { %1458 = vst [vmem:[%s1804_s12 + $0x68] sm:$0xff] %v1434_v18   ;;  %v582_v21 = vpop.f32.mrf.mxu2  ;;  %v602_v22 = vpop.f32.mrf.mxu3 }
  0xc3   : > { %v544_v23 = vpop.f32.mrf.mxu0  ;;  %v564_v24 = vpop.f32.mrf.mxu1  ;;  %v735_v34 = vadd.f32 %v1795_v26, %v582_v21  ;;  %v743_v35 = vadd.f32 %v1795_v26, %v602_v22 }
  0xc4   : > { %v720_v25 = vadd.f32 %v1795_v26, %v544_v23  ;;  %v728_v27 = vadd.f32 %v1795_v26, %v564_v24 }
  0xc5   : > { %v767_v42 = vmax.f32 %v735_v34, 0.0  ;;  %v775_v43 = vmax.f32 %v743_v35, 0.0 }
  0xc6   : > { %v752_v30 = vmax.f32 %v720_v25, 0.0  ;;  %v760_v31 = vmax.f32 %v728_v27, 0.0 }
  0xc8   : > { %v1379_v32 = vpack.c.bf16 %v752_v30, %v751_v28  ;;  %v1399_v33 = vpack.c.bf16 %v760_v31, %v759_v29 }
  0xca   : > { %1447 = vst [vmem:[%s1804_s12 + $0x10] sm:$0xff] %v1379_v32   ;;  %v584_v36 = vpop.f32.mrf.mxu2  ;;  %v604_v37 = vpop.f32.mrf.mxu3 }
  0xcb   : > { %1451 = vst [vmem:[%s1804_s12 + $0x30] sm:$0xff] %v1399_v33   ;;  %v736_v38 = vadd.f32 %v1795_v26, %v584_v36  ;;  %v744_v39 = vadd.f32 %v1795_v26, %v604_v37  ;;  %v547_v40 = vpop.f32.mrf.mxu0  ;;  %v567_v41 = vpop.f32.mrf.mxu1 }
  0xcc   : > { %v721_v48 = vadd.f32 %v1795_v26, %v547_v40  ;;  %v729_v49 = vadd.f32 %v1795_v26, %v567_v41 }
  0xcd   : > { %v768_v44 = vmax.f32 %v736_v38, 0.0  ;;  %v776_v45 = vmax.f32 %v744_v39, 0.0 }
  0xce   : > { %v753_v56 = vmax.f32 %v721_v48, 0.0  ;;  %v761_v57 = vmax.f32 %v729_v49, 0.0 }
  0xcf   : > { %v1419_v46 = vpack.c.bf16 %v768_v44, %v767_v42  ;;  %v1439_v47 = vpack.c.bf16 %v776_v45, %v775_v43 }
  0xd1   : > { %1455 = vst [vmem:[%s1804_s12 + $0x50] sm:$0xff] %v1419_v46  }
  0xd2   : > { %1459 = vst [vmem:[%s1804_s12 + $0x70] sm:$0xff] %v1439_v47   ;;  %v587_v50 = vpop.f32.mrf.mxu2  ;;  %v607_v51 = vpop.f32.mrf.mxu3 }
  0xd3   : > { %v549_v52 = vpop.f32.mrf.mxu0  ;;  %v569_v53 = vpop.f32.mrf.mxu1  ;;  %v737_v62 = vadd.f32 %v1795_v26, %v587_v50  ;;  %v745_v63 = vadd.f32 %v1795_v26, %v607_v51 }
  0xd4   : > { %v722_v54 = vadd.f32 %v1795_v26, %v549_v52  ;;  %v730_v55 = vadd.f32 %v1795_v26, %v569_v53 }
  0xd5   : > { %v769_v4 = vmax.f32 %v737_v62, 0.0  ;;  %v777_v5 = vmax.f32 %v745_v63, 0.0 }
  0xd6   : > { %v754_v58 = vmax.f32 %v722_v54, 0.0  ;;  %v762_v59 = vmax.f32 %v730_v55, 0.0 }
  0xd8   : > { %v1384_v60 = vpack.c.bf16 %v754_v58, %v753_v56  ;;  %v1404_v61 = vpack.c.bf16 %v762_v59, %v761_v57 }
  0xda   : > { %1448 = vst [vmem:[%s1804_s12 + $0x18] sm:$0xff] %v1384_v60   ;;  %v589_v0 = vpop.f32.mrf.mxu2  ;;  %v609_v1 = vpop.f32.mrf.mxu3 }
  0xdb   : > { %1452 = vst [vmem:[%s1804_s12 + $0x38] sm:$0xff] %v1404_v61   ;;  %v738_v2 = vadd.f32 %v1795_v26, %v589_v0  ;;  %v746_v3 = vadd.f32 %v1795_v26, %v609_v1 }
  0xdd   : > { %v770_v6 = vmax.f32 %v738_v2, 0.0  ;;  %v778_v7 = vmax.f32 %v746_v3, 0.0 }
  0xde   : > { %849 = sbr.rel (!%p1730_p3) target bundleno = 291 (0x123), region = 44 }
  0xdf   : > { %v1424_v8 = vpack.c.bf16 %v770_v6, %v769_v4  ;;  %v1444_v9 = vpack.c.bf16 %v778_v7, %v777_v5 }
  0xe1   : > { %1456 = vst [vmem:[%s1804_s12 + $0x58] sm:$0xff] %v1424_v8  }
  0xe2   : > { %1460 = vst [vmem:[%s1804_s12 + $0x78] sm:$0xff] %v1444_v9  }
  0xe3   : > { %s2012_s17 = smov (!%p852_p9, %s851_s17), 32 }
  0xe4   : > { %s1330_s25 = sshll.u32 %s2012_s17, 2 }
  0xe5   : > { %p1333_p10 = scmp.eq.s32.totalorder %s1330_s25, 0 }
  0xe6   : > { %s1861_s26 = sshrl.u32 (!%p1333_p10), %s2012_s17, 5 }
  0xe7   : > { %861 = sbr.rel (%p1333_p10) target bundleno = 291 (0x123), region = 48  ;;  %p1334_p11 = scmp.le.s32.totalorder (!%p1333_p10), %s1861_s26, 0 }
  0xec   : > { %1157 = sbr.rel (%p1334_p11) target bundleno = 274 (0x112), region = 126  ;;  %s2000_s14 = smov (!%p1334_p11), %s1855_s24 }
  0xed   : > { %s2001_s20 = smov (!%p1334_p11), %s1804_s12  ;;  %s1870_s27 = smov (!%p1334_p11), 0  }
  0xee   : > { %s1872_s28 = smov (!%p1334_p11), 0  }
  0xf1 LB: >> { %v878_v26 = vld [vmem:[%s1651_s20] sm:$0xf]  ;;  %v880_v10 = vld [vmem:[%s1651_s20 + $0x4] sm:$0xf]  ;;  %v882_v11 = vld [vmem:[%s1651_s20 + $0x8] sm:$0xf]  ;;  %s1659_s28 = sphi %s1872_s28, %s872_s28   ;;  %s1655_s27 = sphi %s1870_s27, %s2004_s27   ;;  %s1651_s20 = sphi %s2001_s20, %s2003_s20   ;;  %s1647_s14 = sphi %s2000_s14, %s2002_s14  }
  0xf2   : >> { %879 = vst [vmem:[%s1647_s14] sm:$0xf] %v878_v26  ;;  %v884_v12 = vld [vmem:[%s1651_s20 + $0xc] sm:$0xf]  ;;  %v886_v13 = vld [vmem:[%s1651_s20 + $0x10] sm:$0xf]  ;;  %s942_s29 = sadd.s32 1, %s1655_s27 }
  0xf3   : >> { %881 = vst [vmem:[%s1647_s14 + $0x4] sm:$0xf] %v880_v10  ;;  %v888_v14 = vld [vmem:[%s1651_s20 + $0x14] sm:$0xf]  ;;  %v890_v15 = vld [vmem:[%s1651_s20 + $0x18] sm:$0xf]  ;;  %p943_p12 = scmp.ge.s32.totalorder %s942_s29, %s1861_s26 }
  0xf4   : >> { %883 = vst [vmem:[%s1647_s14 + $0x8] sm:$0xf] %v882_v11  ;;  %v892_v16 = vld [vmem:[%s1651_s20 + $0x1c] sm:$0xf]  ;;  %v894_v17 = vld [vmem:[%s1651_s20 + $0x20] sm:$0xf] }
  0xf5   : >> { %885 = vst [vmem:[%s1647_s14 + $0xc] sm:$0xf] %v884_v12  ;;  %v896_v18 = vld [vmem:[%s1651_s20 + $0x24] sm:$0xf]  ;;  %v898_v19 = vld [vmem:[%s1651_s20 + $0x28] sm:$0xf] }
  0xf6   : >> { %887 = vst [vmem:[%s1647_s14 + $0x10] sm:$0xf] %v886_v13  ;;  %v900_v20 = vld [vmem:[%s1651_s20 + $0x2c] sm:$0xf]  ;;  %v902_v21 = vld [vmem:[%s1651_s20 + $0x30] sm:$0xf] }
  0xf7   : >> { %889 = vst [vmem:[%s1647_s14 + $0x14] sm:$0xf] %v888_v14  ;;  %v904_v22 = vld [vmem:[%s1651_s20 + $0x34] sm:$0xf]  ;;  %v906_v23 = vld [vmem:[%s1651_s20 + $0x38] sm:$0xf] }
  0xf8   : >> { %891 = vst [vmem:[%s1647_s14 + $0x18] sm:$0xf] %v890_v15  ;;  %v908_v24 = vld [vmem:[%s1651_s20 + $0x3c] sm:$0xf]  ;;  %v910_v25 = vld [vmem:[%s1651_s20 + $0x40] sm:$0xf] }
  0xf9   : >> { %893 = vst [vmem:[%s1647_s14 + $0x1c] sm:$0xf] %v892_v16  ;;  %v912_v27 = vld [vmem:[%s1651_s20 + $0x44] sm:$0xf]  ;;  %s2014_s29 = smov (%p943_p12, %s942_s29), 0  ;;  %s872_s28 = sadd.s32 1, %s1659_s28  }
  0xfa   : >> { %895 = vst [vmem:[%s1647_s14 + $0x20] sm:$0xf] %v894_v17  ;;  %v914_v28 = vld [vmem:[%s1651_s20 + $0x48] sm:$0xf]  ;;  %v916_v29 = vld [vmem:[%s1651_s20 + $0x4c] sm:$0xf]  ;;  %p871_p13 = scmp.ge.s32.totalorder %s872_s28, %s1861_s26  ;;  %s2004_s27 = smov %s2014_s29 }
  0xfb   : >> { %897 = vst [vmem:[%s1647_s14 + $0x24] sm:$0xf] %v896_v18  ;;  %s1335_s30 = sshll.u32 %s2014_s29, 7  ;;  %v918_v30 = vld [vmem:[%s1651_s20 + $0x50] sm:$0xf] }
  0xfc   : >> { %899 = vst [vmem:[%s1647_s14 + $0x28] sm:$0xf] %v898_v19  ;;  %s1931_s4 = scalar_lea.vmem %s1804_s12, %s1335_s30 [#allocation3]   ;;  %s948_s5 = scalar_lea.vmem %s1855_s24, %s1335_s30   ;;  %v920_v31 = vld [vmem:[%s1651_s20 + $0x54] sm:$0xf]  ;;  %v922_v32 = vld [vmem:[%s1651_s20 + $0x58] sm:$0xf] }
  0xfd   : >> { %901 = vst [vmem:[%s1647_s14 + $0x2c] sm:$0xf] %v900_v20  ;;  %v924_v33 = vld [vmem:[%s1651_s20 + $0x5c] sm:$0xf]  ;;  %v926_v34 = vld [vmem:[%s1651_s20 + $0x60] sm:$0xf] }
  0xfe   : >> { %903 = vst [vmem:[%s1647_s14 + $0x30] sm:$0xf] %v902_v21  ;;  %v928_v35 = vld [vmem:[%s1651_s20 + $0x64] sm:$0xf]  ;;  %v930_v36 = vld [vmem:[%s1651_s20 + $0x68] sm:$0xf] }
  0xff   : >> { %905 = vst [vmem:[%s1647_s14 + $0x34] sm:$0xf] %v904_v22  ;;  %v932_v37 = vld [vmem:[%s1651_s20 + $0x6c] sm:$0xf]  ;;  %v934_v38 = vld [vmem:[%s1651_s20 + $0x70] sm:$0xf] }
 0x100   : >> { %907 = vst [vmem:[%s1647_s14 + $0x38] sm:$0xf] %v906_v23  ;;  %v936_v39 = vld [vmem:[%s1651_s20 + $0x74] sm:$0xf]  ;;  %v938_v40 = vld [vmem:[%s1651_s20 + $0x78] sm:$0xf] }
 0x101   : >> { %909 = vst [vmem:[%s1647_s14 + $0x3c] sm:$0xf] %v908_v24  ;;  %v940_v41 = vld [vmem:[%s1651_s20 + $0x7c] sm:$0xf]  ;;  %s2003_s20 = smov %s1931_s4 }
 0x102   : >> { %911 = vst [vmem:[%s1647_s14 + $0x40] sm:$0xf] %v910_v25 }
 0x103   : >> { %913 = vst [vmem:[%s1647_s14 + $0x44] sm:$0xf] %v912_v27 }
 0x104   : >> { %915 = vst [vmem:[%s1647_s14 + $0x48] sm:$0xf] %v914_v28 }
 0x105   : >> { %917 = vst [vmem:[%s1647_s14 + $0x4c] sm:$0xf] %v916_v29 }
 0x106   : >> { %919 = vst [vmem:[%s1647_s14 + $0x50] sm:$0xf] %v918_v30 }
 0x107   : >> { %921 = vst [vmem:[%s1647_s14 + $0x54] sm:$0xf] %v920_v31 }
 0x108   : >> { %923 = vst [vmem:[%s1647_s14 + $0x58] sm:$0xf] %v922_v32 }
 0x109   : >> { %925 = vst [vmem:[%s1647_s14 + $0x5c] sm:$0xf] %v924_v33 }
 0x10a   : >> { %927 = vst [vmem:[%s1647_s14 + $0x60] sm:$0xf] %v926_v34 }
 0x10b   : >> { %929 = vst [vmem:[%s1647_s14 + $0x64] sm:$0xf] %v928_v35 }
 0x10c   : >> { %931 = vst [vmem:[%s1647_s14 + $0x68] sm:$0xf] %v930_v36 }
 0x10d   : >> { %933 = vst [vmem:[%s1647_s14 + $0x6c] sm:$0xf] %v932_v37  ;;  %874 = sbr.rel (!%p871_p13) target bundleno = 241 (0xf1), region = 132 }
 0x10e   : >> { %935 = vst [vmem:[%s1647_s14 + $0x70] sm:$0xf] %v934_v38 }
 0x10f   : >> { %937 = vst [vmem:[%s1647_s14 + $0x74] sm:$0xf] %v936_v39 }
 0x110   : >> { %939 = vst [vmem:[%s1647_s14 + $0x78] sm:$0xf] %v938_v40 }
 0x111   : >> { %941 = vst [vmem:[%s1647_s14 + $0x7c] sm:$0xf] %v940_v41  ;;  %s2002_s14 = smov %s948_s5 }
 0x112 PF: > { %s1972_s6 = sand.u32 31, %s2012_s17   ;;  %s1364_s7 = sshll.u32 %s1861_s26, 7 }
 0x113   : > { %s953_s8 = scalar_lea.vmem %s1804_s12, %s1364_s7 [#allocation3]   ;;  %s955_s9 = scalar_lea.vmem %s1855_s24, %s1364_s7  }
 0x114   : > { %p1340_p0 = scmp.le.s32.totalorder %s1972_s6, 0 }
 0x115   : > { %s1661_s10 = smov (!%p1340_p0), %s955_s9   ;;  %s1665_s11 = smov (!%p1340_p0), %s953_s8  }
 0x116   : > { %1171 = sbr.rel (%p1340_p0) target bundleno = 291 (0x123), region = 137  ;;  %s1669_s19 = smov (!%p1340_p0), 0  }
 0x117   : > { %s1673_s21 = smov (!%p1340_p0), 0  }
 0x11b LB: >> { %v965_v42 = vld [vmem:[%s1667_s11] sm:$0xf]  ;;  %s967_s17 = sadd.s32 1, %s1671_s19  ;;  %s959_s21 = sadd.s32 1, %s1675_s21   ;;  %s1675_s21 = sphi %s1673_s21, %s959_s21   ;;  %s1671_s19 = sphi %s1669_s19, %s1670_s19   ;;  %s1667_s11 = sphi %s1665_s11, %s972_s11   ;;  %s1663_s10 = sphi %s1661_s10, %s973_s10  }
 0x11c   : >> { %966 = vst [vmem:[%s1663_s10] sm:$0xf] %v965_v42  ;;  %p968_p1 = scmp.ge.s32.totalorder %s967_s17, %s1972_s6  ;;  %p958_p2 = scmp.ge.s32.totalorder %s959_s21, %s1972_s6 }
 0x11e   : >> { %s2016_s17 = smov (%p968_p1, %s967_s17), 0  ;;  %961 = sbr.rel (!%p958_p2) target bundleno = 283 (0x11b), region = 143 }
 0x11f   : >> { %s1341_s12 = sshll.u32 %s2016_s17, 2  ;;  %s1670_s19 = smov %s2016_s17  }
 0x120   : >> { %s972_s11 = scalar_lea.vmem %s953_s8, %s1341_s12 [#allocation3]   ;;  %s973_s10 = scalar_lea.vmem %s955_s9, %s1341_s12  }
 0x123 PF: > { %s13_s16 = sadd.s32 1, %s1643_s16   ;;  %s2005_s12 = smov %s1631_s13 }
 0x124   : > { %p10_p3 = scmp.ge.s32.totalorder %s13_s16, 176   ;;  %s2006_s13 = smov %s1739_s22 }
 0x125   : > { %s2007_s14 = smov %s1639_s15  ;;  %s2008_s15 = smov %s2010_s18 }
 0x126   :  { %12 = sbr.rel (!%p10_p3) target bundleno = 3 (0x3), region = 154 }

</bundles_post_ra>
